<compile_context>
chip_gen: v6e
topology: v6e:2x2x1
jax: 0.10.0
libtpu: 0.0.40
codegen_flags: <defaults>
</compile_context>

<pallas_src>
import functools

import jax
import jax.numpy as jnp
from jax.experimental import pallas as pl
from jax.experimental.pallas import tpu as pltpu


# ----------------------------------------------------------------------------
# Pallas kernel: in-kernel patch taps + conv matmul + IN + AdaIN + LeakyReLU
# ----------------------------------------------------------------------------

def _make_kernel(tap_offsets, cout, pw, wp, wo, p_valid, eps=1e-5, slope=0.2):
    inv_p = 1.0 / float(p_valid)
    n_taps = len(tap_offsets)

    def kernel(x_ref, w_ref, mod_ref, o_ref):
        # x_ref   : [Cin_eff, Lpad]  bf16  (zero-padded activation, flattened)
        # w_ref   : [T, Cout, Cin_eff] bf16 (per-tap weight slabs)
        # mod_ref : [2*Cout, 1] f32  (AdaIN scale rows 0:C, shift rows C:2C)
        # o_ref   : [Cout, Pw]       ("wide" output incl. junk columns)

        # Conv as T accumulating MXU matmuls over shifted flattened views
        # (in-kernel im2col; each tap is a contiguous lane slice).
        acc = jnp.dot(w_ref[0], x_ref[:, pl.ds(tap_offsets[0], pw)],
                      preferred_element_type=jnp.float32)
        for t in range(1, n_taps):
            acc = acc + jnp.dot(w_ref[t], x_ref[:, pl.ds(tap_offsets[t], pw)],
                                preferred_element_type=jnp.float32)

        # InstanceNorm2d stats, one pass (f32 sums), junk columns masked out.
        if wo == wp:
            ym = acc
        else:
            col = jax.lax.broadcasted_iota(jnp.int32, (1, pw), 1)
            ym = jnp.where((col % wp) < wo, acc, 0.0)
        s = jnp.sum(ym, axis=1, keepdims=True)               # [C, 1]
        ss = jnp.sum(ym * ym, axis=1, keepdims=True)          # [C, 1]
        mean = s * inv_p
        var = ss * inv_p - mean * mean

        # IN + AdaIN fused into one per-channel affine:  y = acc*a + b.
        a = mod_ref[pl.ds(0, cout), :] * jax.lax.rsqrt(var + eps)   # scale/std
        b = mod_ref[pl.ds(cout, cout), :] - mean * a                # shift-mean*a
        y = acc * a + b

        # LeakyReLU(0.2).
        o_ref[...] = jnp.where(y > 0, y, slope * y).astype(o_ref.dtype)

    return kernel


def conv_adain_pallas(x_flat, w_taps, modcol, tap_offsets, pw, wp, wo, p_valid,
                      out_dtype=jnp.float32):
    """x_flat [N,Cin_eff,Lpad] bf16, w_taps [T,Cout,Cin_eff] bf16,
    modcol [N,2*Cout,1] f32  ->  wide output [N, Cout, Pw]."""
    n, cin_eff, lpad = x_flat.shape
    t, cout, _ = w_taps.shape
    return pl.pallas_call(
        _make_kernel(tuple(int(o) for o in tap_offsets), cout, pw, wp, wo,
                     p_valid),
        out_shape=jax.ShapeDtypeStruct((n, cout, pw), out_dtype),
        grid=(n,),
        in_specs=[
            pl.BlockSpec((None, cin_eff, lpad), lambda i: (i, 0, 0)),
            pl.BlockSpec((t, cout, cin_eff), lambda i: (0, 0, 0)),  # resident
            pl.BlockSpec((None, 2 * cout, 1), lambda i: (i, 0, 0)),
        ],
        out_specs=pl.BlockSpec((None, cout, pw), lambda i: (i, 0, 0)),
        compiler_params=pltpu.CompilerParams(
            dimension_semantics=("parallel",)),
    )(x_flat, w_taps, modcol)


# ----------------------------------------------------------------------------
# Glue: weight prep (spectral norm), style affine, stride handling
# ----------------------------------------------------------------------------

# TODO(synk): the spectral-norm power iteration and the tiny style->(scale,shift)
# Linear are parameter/side prep (O(C*style_dim) work) kept as plain-JAX glue.

def spectral_normalize(w, key, n_iter=1):
    """Mimic torch.nn.utils.spectral_norm at the first (train-mode) forward."""
    w_mat = w.reshape(w.shape[0], -1)
    u = jax.random.normal(key, (w_mat.shape[0],), jnp.float32)
    u = u / (jnp.linalg.norm(u) + 1e-12)
    v = jnp.zeros((w_mat.shape[1],), jnp.float32)
    for _ in range(max(1, n_iter)):
        v = w_mat.T @ u
        v = v / (jnp.linalg.norm(v) + 1e-12)
        u = w_mat @ v
        u = u / (jnp.linalg.norm(u) + 1e-12)
    sigma = u @ (w_mat @ v)
    return w / sigma


def make_params(key, in_channels, out_channels, style_dim):
    k1, k2, k3, k4, k5 = jax.random.split(key, 5)
    w = 0.1 * jax.random.normal(k1, (out_channels, in_channels, 3, 3), jnp.float32)
    b = 0.1 * jax.random.normal(k3, (out_channels,), jnp.float32)
    aff_w = 0.1 * jax.random.normal(k4, (2 * out_channels, style_dim), jnp.float32)
    # sn=True on both the conv and the AdaIN affine Linear.
    w = spectral_normalize(w, k2)
    aff_w = spectral_normalize(aff_w, k5)
    # AdaIN affine_bias: first half ones (scale), second half zeros (shift).
    aff_b = jnp.concatenate([jnp.ones((out_channels,), jnp.float32),
                             jnp.zeros((out_channels,), jnp.float32)])
    # conv bias is kept for module fidelity but is a mathematical no-op under
    # InstanceNorm(affine=False); the kernel does not consume it.
    return {"conv_w": w, "conv_b": b, "aff_w": aff_w, "aff_b": aff_b}


def conv_adain_block(x, style, params, stride, out_dtype=jnp.float32):
    """ConvAdaINBlock.forward(x, style) -> [N, Cout, Ho, Wo]."""
    assert stride in (1, 2)
    N, Cin, H, W = x.shape
    Cout = params["conv_w"].shape[0]
    pad, k = 1, 3
    Ho = (H + 2 * pad - k) // stride + 1
    Wo = (W + 2 * pad - k) // stride + 1

    # AdaIN style affine (Linear bias=False) + affine_bias, packed into one
    # per-sample [2C, 1] column (single tiny DMA per grid step).
    mod = style @ params["aff_w"].T + params["aff_b"]          # [N, 2C]
    modcol = mod.reshape(N, 2 * Cout, 1).astype(jnp.float32)

    # Zero-pad + bf16 cast in one pass; no im2col materialization.
    xp = jnp.pad(x, ((0, 0), (0, 0), (pad, pad), (pad, pad))).astype(jnp.bfloat16)
    Hp, Wp = H + 2 * pad, W + 2 * pad
    w = params["conv_w"]

    if stride == 1:
        cin_eff = Cin
        wp_eff = Wp
        x_flat = xp.reshape(N, Cin, Hp * Wp)
        # per-tap weight slabs, tap = ky*3 + kx
        w_taps = jnp.transpose(w, (2, 3, 0, 1)).reshape(9, Cout, Cin)
        offsets = [ky * Wp + kx for ky in range(3) for kx in range(3)]
    else:
        # stride 2: space-to-depth the padded input -> stride-1 2x2-tap conv
        # over 4*Cin merged channels (single 1x read/write of the activation).
        assert Hp % 2 == 0 and Wp % 2 == 0, "stride=2 path expects even H, W"
        Hq, Wq = Hp // 2, Wp // 2
        cin_eff = 4 * Cin
        wp_eff = Wq
        xd = xp.reshape(N, Cin, Hq, 2, Wq, 2)                  # [n,c,r,by,t,bx]
        xd = jnp.transpose(xd, (0, 3, 5, 1, 2, 4))             # [n,by,bx,c,r,t]
        x_flat = xd.reshape(N, cin_eff, Hq * Wq)
        wpd = jnp.pad(w, ((0, 0), (0, 0), (0, 1), (0, 1)))     # 3x3 -> 4x4 (zeros)
        w6 = wpd.reshape(Cout, Cin, 2, 2, 2, 2)                # [o,c,ay,by,ax,bx]
        w_taps = jnp.transpose(w6, (2, 4, 0, 3, 5, 1)).reshape(4, Cout, cin_eff)
        offsets = [ay * Wq + ax for ay in range(2) for ax in range(2)]

    Pw = Ho * wp_eff                    # "wide" spatial extent (junk cols incl.)
    L = x_flat.shape[-1]
    need = max(L, max(offsets) + Pw)
    Lpad = ((need + 127) // 128) * 128  # lane-aligned; overflow lands in zeros
    if Lpad > L:
        x_flat = jnp.pad(x_flat, ((0, 0), (0, 0), (0, Lpad - L)))
    w_taps = w_taps.astype(jnp.bfloat16)

    out = conv_adain_pallas(x_flat, w_taps, modcol, offsets, Pw, wp_eff, Wo,
                            Ho * Wo, out_dtype)                # [N, C, Pw]
    # Drop the junk columns (cheap XLA slice); result is NCHW.
    return out.reshape(N, Cout, Ho, wp_eff)[:, :, :, :Wo]


# ----------------------------------------------------------------------------
# Plain-JAX reference (conv operands rounded to bf16 to match the MXU path)
# ----------------------------------------------------------------------------

def reference_forward(x, style, params, stride):
    w = params["conv_w"]
    Cout = w.shape[0]
    xr = x.astype(jnp.bfloat16).astype(jnp.float32)
    wr = w.astype(jnp.bfloat16).astype(jnp.float32)
    y = jax.lax.conv_general_dilated(
        xr, wr, window_strides=(stride, stride), padding=((1, 1), (1, 1)),
        dimension_numbers=("NCHW", "OIHW", "NCHW"))
    y = y + params["conv_b"][None, :, None, None]
    mean = jnp.mean(y, axis=(2, 3), keepdims=True)
    var = jnp.mean(jnp.square(y - mean), axis=(2, 3), keepdims=True)
    yn = (y - mean) * jax.lax.rsqrt(var + 1e-5)
    mod = style @ params["aff_w"].T + params["aff_b"]
    scale = mod[:, :Cout][:, :, None, None]
    shift = mod[:, Cout:][:, :, None, None]
    out = scale * yn + shift
    return jnp.where(out > 0, out, 0.2 * out)


# ----------------------------------------------------------------------------
# Main
# ----------------------------------------------------------------------------

if __name__ == "__main__":
    key = jax.random.PRNGKey(0)
    k_x, k_s, k_p = jax.random.split(key, 3)

    # Small config: batch=2, in_channels=4, out_channels=8, style_dim=8, 16x16.
    N, Cin, H, W = 2, 4, 16, 16
    Cout, style_dim = 8, 8

    x = jax.random.normal(k_x, (N, Cin, H, W), dtype=jnp.float32)
    style = jax.random.normal(k_s, (N, style_dim), dtype=jnp.float32)
    params = make_params(k_p, Cin, Cout, style_dim)

    for stride in (1, 2):   # stride=1 (lane-dense Pw=288) and stride=2 downsample
        fwd = jax.jit(functools.partial(conv_adain_block, params=params,
                                        stride=stride))
        out = jax.block_until_ready(fwd(x, style))
        Ho = (H + 2 - 3) // stride + 1
        assert out.shape == (N, Cout, Ho, Ho), out.shape
        assert bool(jnp.all(jnp.isfinite(out)))
        ref = reference_forward(x, style, params, stride)
        err = float(jnp.max(jnp.abs(out - ref)))
        assert err < 2e-2, err

    print("KERNEL_OK")
</pallas_src>

<mosaic_0001>
module attributes {stable_mosaic.version = 11 : i64} {
  func.func @kernel(%arg0: i32, %arg1: memref<1x4x384xbf16, #tpu.memory_space<vmem>>, %arg2: memref<9x8x4xbf16, #tpu.memory_space<vmem>>, %arg3: memref<1x16x1xf32, #tpu.memory_space<vmem>>, %arg4: memref<1x8x288xf32, #tpu.memory_space<vmem>>) attributes {dimension_semantics = [#tpu.dimension_semantics<parallel>], iteration_bounds = array<i64: 2>, scalar_prefetch = 0 : i64, scratch_operands = 0 : i64, tpu.core_type = #tpu.core_type<tc>, window_params = [{transform_indices = @transform_0, window_bounds = array<i64: 1, 4, 384>}, {pipeline_mode = #tpu.pipeline_mode<synchronous>, transform_indices = @transform_1, window_bounds = array<i64: 9, 8, 4>}, {transform_indices = @transform_2, window_bounds = array<i64: 1, 16, 1>}, {transform_indices = @transform_3, window_bounds = array<i64: 1, 8, 288>}]} {
    %c0 = arith.constant 0 : index
    %c0_0 = arith.constant 0 : index
    %c0_1 = arith.constant 0 : index
    %0 = vector.load %arg2[%c0, %c0_0, %c0_1] : memref<9x8x4xbf16, #tpu.memory_space<vmem>>, vector<1x8x4xbf16>
    %1 = vector.shape_cast %0 : vector<1x8x4xbf16> to vector<8x4xbf16>
    %c0_2 = arith.constant 0 : index
    %c0_3 = arith.constant 0 : index
    %c0_4 = arith.constant 0 : index
    %2 = vector.load %arg1[%c0_2, %c0_3, %c0_4] : memref<1x4x384xbf16, #tpu.memory_space<vmem>>, vector<1x4x288xbf16>
    %3 = vector.shape_cast %2 : vector<1x4x288xbf16> to vector<4x288xbf16>
    %cst = arith.constant dense<0.000000e+00> : vector<8x288xf32>
    %4 = tpu.matmul %1, %3, %cst {dimension_numbers = #tpu.dot_dimension_numbers<[1], [0], [0], [1], [0, 0, 1, 1], [], []>} : vector<8x4xbf16>, vector<4x288xbf16>, vector<8x288xf32> -> vector<8x288xf32>
    %c1 = arith.constant 1 : index
    %c0_5 = arith.constant 0 : index
    %c0_6 = arith.constant 0 : index
    %5 = vector.load %arg2[%c1, %c0_5, %c0_6] : memref<9x8x4xbf16, #tpu.memory_space<vmem>>, vector<1x8x4xbf16>
    %6 = vector.shape_cast %5 : vector<1x8x4xbf16> to vector<8x4xbf16>
    %c0_7 = arith.constant 0 : index
    %c0_8 = arith.constant 0 : index
    %c1_9 = arith.constant 1 : index
    %7 = vector.load %arg1[%c0_7, %c0_8, %c1_9] : memref<1x4x384xbf16, #tpu.memory_space<vmem>>, vector<1x4x288xbf16>
    %8 = vector.shape_cast %7 : vector<1x4x288xbf16> to vector<4x288xbf16>
    %cst_10 = arith.constant dense<0.000000e+00> : vector<8x288xf32>
    %9 = tpu.matmul %6, %8, %cst_10 {dimension_numbers = #tpu.dot_dimension_numbers<[1], [0], [0], [1], [0, 0, 1, 1], [], []>} : vector<8x4xbf16>, vector<4x288xbf16>, vector<8x288xf32> -> vector<8x288xf32>
    %10 = arith.addf %4, %9 : vector<8x288xf32>
    %c2 = arith.constant 2 : index
    %c0_11 = arith.constant 0 : index
    %c0_12 = arith.constant 0 : index
    %11 = vector.load %arg2[%c2, %c0_11, %c0_12] : memref<9x8x4xbf16, #tpu.memory_space<vmem>>, vector<1x8x4xbf16>
    %12 = vector.shape_cast %11 : vector<1x8x4xbf16> to vector<8x4xbf16>
    %c0_13 = arith.constant 0 : index
    %c0_14 = arith.constant 0 : index
    %c2_15 = arith.constant 2 : index
    %13 = vector.load %arg1[%c0_13, %c0_14, %c2_15] : memref<1x4x384xbf16, #tpu.memory_space<vmem>>, vector<1x4x288xbf16>
    %14 = vector.shape_cast %13 : vector<1x4x288xbf16> to vector<4x288xbf16>
    %cst_16 = arith.constant dense<0.000000e+00> : vector<8x288xf32>
    %15 = tpu.matmul %12, %14, %cst_16 {dimension_numbers = #tpu.dot_dimension_numbers<[1], [0], [0], [1], [0, 0, 1, 1], [], []>} : vector<8x4xbf16>, vector<4x288xbf16>, vector<8x288xf32> -> vector<8x288xf32>
    %16 = arith.addf %10, %15 : vector<8x288xf32>
    %c3 = arith.constant 3 : index
    %c0_17 = arith.constant 0 : index
    %c0_18 = arith.constant 0 : index
    %17 = vector.load %arg2[%c3, %c0_17, %c0_18] : memref<9x8x4xbf16, #tpu.memory_space<vmem>>, vector<1x8x4xbf16>
    %18 = vector.shape_cast %17 : vector<1x8x4xbf16> to vector<8x4xbf16>
    %c0_19 = arith.constant 0 : index
    %c0_20 = arith.constant 0 : index
    %c18 = arith.constant 18 : index
    %19 = vector.load %arg1[%c0_19, %c0_20, %c18] : memref<1x4x384xbf16, #tpu.memory_space<vmem>>, vector<1x4x288xbf16>
    %20 = vector.shape_cast %19 : vector<1x4x288xbf16> to vector<4x288xbf16>
    %cst_21 = arith.constant dense<0.000000e+00> : vector<8x288xf32>
    %21 = tpu.matmul %18, %20, %cst_21 {dimension_numbers = #tpu.dot_dimension_numbers<[1], [0], [0], [1], [0, 0, 1, 1], [], []>} : vector<8x4xbf16>, vector<4x288xbf16>, vector<8x288xf32> -> vector<8x288xf32>
    %22 = arith.addf %16, %21 : vector<8x288xf32>
    %c4 = arith.constant 4 : index
    %c0_22 = arith.constant 0 : index
    %c0_23 = arith.constant 0 : index
    %23 = vector.load %arg2[%c4, %c0_22, %c0_23] : memref<9x8x4xbf16, #tpu.memory_space<vmem>>, vector<1x8x4xbf16>
    %24 = vector.shape_cast %23 : vector<1x8x4xbf16> to vector<8x4xbf16>
    %c0_24 = arith.constant 0 : index
    %c0_25 = arith.constant 0 : index
    %c19 = arith.constant 19 : index
    %25 = vector.load %arg1[%c0_24, %c0_25, %c19] : memref<1x4x384xbf16, #tpu.memory_space<vmem>>, vector<1x4x288xbf16>
    %26 = vector.shape_cast %25 : vector<1x4x288xbf16> to vector<4x288xbf16>
    %cst_26 = arith.constant dense<0.000000e+00> : vector<8x288xf32>
    %27 = tpu.matmul %24, %26, %cst_26 {dimension_numbers = #tpu.dot_dimension_numbers<[1], [0], [0], [1], [0, 0, 1, 1], [], []>} : vector<8x4xbf16>, vector<4x288xbf16>, vector<8x288xf32> -> vector<8x288xf32>
    %28 = arith.addf %22, %27 : vector<8x288xf32>
    %c5 = arith.constant 5 : index
    %c0_27 = arith.constant 0 : index
    %c0_28 = arith.constant 0 : index
    %29 = vector.load %arg2[%c5, %c0_27, %c0_28] : memref<9x8x4xbf16, #tpu.memory_space<vmem>>, vector<1x8x4xbf16>
    %30 = vector.shape_cast %29 : vector<1x8x4xbf16> to vector<8x4xbf16>
    %c0_29 = arith.constant 0 : index
    %c0_30 = arith.constant 0 : index
    %c20 = arith.constant 20 : index
    %31 = vector.load %arg1[%c0_29, %c0_30, %c20] : memref<1x4x384xbf16, #tpu.memory_space<vmem>>, vector<1x4x288xbf16>
    %32 = vector.shape_cast %31 : vector<1x4x288xbf16> to vector<4x288xbf16>
    %cst_31 = arith.constant dense<0.000000e+00> : vector<8x288xf32>
    %33 = tpu.matmul %30, %32, %cst_31 {dimension_numbers = #tpu.dot_dimension_numbers<[1], [0], [0], [1], [0, 0, 1, 1], [], []>} : vector<8x4xbf16>, vector<4x288xbf16>, vector<8x288xf32> -> vector<8x288xf32>
    %34 = arith.addf %28, %33 : vector<8x288xf32>
    %c6 = arith.constant 6 : index
    %c0_32 = arith.constant 0 : index
    %c0_33 = arith.constant 0 : index
    %35 = vector.load %arg2[%c6, %c0_32, %c0_33] : memref<9x8x4xbf16, #tpu.memory_space<vmem>>, vector<1x8x4xbf16>
    %36 = vector.shape_cast %35 : vector<1x8x4xbf16> to vector<8x4xbf16>
    %c0_34 = arith.constant 0 : index
    %c0_35 = arith.constant 0 : index
    %c36 = arith.constant 36 : index
    %37 = vector.load %arg1[%c0_34, %c0_35, %c36] : memref<1x4x384xbf16, #tpu.memory_space<vmem>>, vector<1x4x288xbf16>
    %38 = vector.shape_cast %37 : vector<1x4x288xbf16> to vector<4x288xbf16>
    %cst_36 = arith.constant dense<0.000000e+00> : vector<8x288xf32>
    %39 = tpu.matmul %36, %38, %cst_36 {dimension_numbers = #tpu.dot_dimension_numbers<[1], [0], [0], [1], [0, 0, 1, 1], [], []>} : vector<8x4xbf16>, vector<4x288xbf16>, vector<8x288xf32> -> vector<8x288xf32>
    %40 = arith.addf %34, %39 : vector<8x288xf32>
    %c7 = arith.constant 7 : index
    %c0_37 = arith.constant 0 : index
    %c0_38 = arith.constant 0 : index
    %41 = vector.load %arg2[%c7, %c0_37, %c0_38] : memref<9x8x4xbf16, #tpu.memory_space<vmem>>, vector<1x8x4xbf16>
    %42 = vector.shape_cast %41 : vector<1x8x4xbf16> to vector<8x4xbf16>
    %c0_39 = arith.constant 0 : index
    %c0_40 = arith.constant 0 : index
    %c37 = arith.constant 37 : index
    %43 = vector.load %arg1[%c0_39, %c0_40, %c37] : memref<1x4x384xbf16, #tpu.memory_space<vmem>>, vector<1x4x288xbf16>
    %44 = vector.shape_cast %43 : vector<1x4x288xbf16> to vector<4x288xbf16>
    %cst_41 = arith.constant dense<0.000000e+00> : vector<8x288xf32>
    %45 = tpu.matmul %42, %44, %cst_41 {dimension_numbers = #tpu.dot_dimension_numbers<[1], [0], [0], [1], [0, 0, 1, 1], [], []>} : vector<8x4xbf16>, vector<4x288xbf16>, vector<8x288xf32> -> vector<8x288xf32>
    %46 = arith.addf %40, %45 : vector<8x288xf32>
    %c8 = arith.constant 8 : index
    %c0_42 = arith.constant 0 : index
    %c0_43 = arith.constant 0 : index
    %47 = vector.load %arg2[%c8, %c0_42, %c0_43] : memref<9x8x4xbf16, #tpu.memory_space<vmem>>, vector<1x8x4xbf16>
    %48 = vector.shape_cast %47 : vector<1x8x4xbf16> to vector<8x4xbf16>
    %c0_44 = arith.constant 0 : index
    %c0_45 = arith.constant 0 : index
    %c38 = arith.constant 38 : index
    %49 = vector.load %arg1[%c0_44, %c0_45, %c38] : memref<1x4x384xbf16, #tpu.memory_space<vmem>>, vector<1x4x288xbf16>
    %50 = vector.shape_cast %49 : vector<1x4x288xbf16> to vector<4x288xbf16>
    %cst_46 = arith.constant dense<0.000000e+00> : vector<8x288xf32>
    %51 = tpu.matmul %48, %50, %cst_46 {dimension_numbers = #tpu.dot_dimension_numbers<[1], [0], [0], [1], [0, 0, 1, 1], [], []>} : vector<8x4xbf16>, vector<4x288xbf16>, vector<8x288xf32> -> vector<8x288xf32>
    %52 = arith.addf %46, %51 : vector<8x288xf32>
    %53 = tpu.iota {dimensions = array<i32: 1>} : vector<1x288xi32>
    %c18_i32 = arith.constant 18 : i32
    %c0_i32 = arith.constant 0 : i32
    %54 = arith.cmpi eq, %c18_i32, %c0_i32 : i32
    %c1_i32 = arith.constant 1 : i32
    %55 = arith.select %54, %c1_i32, %c18_i32 : i32
    %56 = vector.broadcast %55 : i32 to vector<1x288xi32>
    %57 = arith.remsi %53, %56 : vector<1x288xi32>
    %c0_i32_47 = arith.constant 0 : i32
    %58 = vector.broadcast %c0_i32_47 : i32 to vector<1x288xi32>
    %59 = arith.cmpi ne, %57, %58 : vector<1x288xi32>
    %c0_i32_48 = arith.constant 0 : i32
    %60 = vector.broadcast %c0_i32_48 : i32 to vector<1x288xi32>
    %61 = arith.cmpi slt, %57, %60 : vector<1x288xi32>
    %c0_i32_49 = arith.constant 0 : i32
    %62 = arith.cmpi slt, %55, %c0_i32_49 : i32
    %63 = vector.broadcast %62 : i1 to vector<1x288xi1>
    %64 = vector.broadcast %63 : vector<1x288xi1> to vector<1x288xi1>
    %65 = arith.xori %61, %64 : vector<1x288xi1>
    %66 = arith.andi %65, %59 : vector<1x288xi1>
    %67 = vector.broadcast %55 : i32 to vector<1x288xi32>
    %68 = arith.addi %57, %67 : vector<1x288xi32>
    %69 = arith.select %66, %68, %57 : vector<1x288xi1>, vector<1x288xi32>
    %c16_i32 = arith.constant 16 : i32
    %70 = vector.broadcast %c16_i32 : i32 to vector<1x288xi32>
    %71 = arith.cmpi slt, %69, %70 : vector<1x288xi32>
    %cst_50 = arith.constant 0.000000e+00 : f32
    %72 = vector.shape_cast %71 : vector<1x288xi1> to vector<1x288xi1>
    %73 = vector.broadcast %72 : vector<1x288xi1> to vector<8x288xi1>
    %74 = vector.broadcast %cst_50 : f32 to vector<8x288xf32>
    %75 = arith.select %73, %52, %74 : vector<8x288xi1>, vector<8x288xf32>
    %cst_51 = arith.constant dense<0.000000e+00> : vector<8xf32>
    %76 = vector.multi_reduction <add>, %75, %cst_51 [1] : vector<8x288xf32> to vector<8xf32>
    %77 = vector.shape_cast %76 : vector<8xf32> to vector<8x1xf32>
    %78 = arith.mulf %75, %75 : vector<8x288xf32>
    %cst_52 = arith.constant dense<0.000000e+00> : vector<8xf32>
    %79 = vector.multi_reduction <add>, %78, %cst_52 [1] : vector<8x288xf32> to vector<8xf32>
    %80 = vector.shape_cast %79 : vector<8xf32> to vector<8x1xf32>
    %cst_53 = arith.constant 3.906250e-03 : f32
    %81 = vector.broadcast %cst_53 : f32 to vector<8x1xf32>
    %82 = arith.mulf %77, %81 : vector<8x1xf32>
    %cst_54 = arith.constant 3.906250e-03 : f32
    %83 = vector.broadcast %cst_54 : f32 to vector<8x1xf32>
    %84 = arith.mulf %80, %83 : vector<8x1xf32>
    %85 = arith.mulf %82, %82 : vector<8x1xf32>
    %86 = arith.subf %84, %85 : vector<8x1xf32>
    %c0_55 = arith.constant 0 : index
    %c0_56 = arith.constant 0 : index
    %c0_57 = arith.constant 0 : index
    %87 = vector.load %arg3[%c0_55, %c0_56, %c0_57] : memref<1x16x1xf32, #tpu.memory_space<vmem>>, vector<1x8x1xf32>
    %88 = vector.shape_cast %87 : vector<1x8x1xf32> to vector<8x1xf32>
    %cst_58 = arith.constant 9.99999974E-6 : f32
    %89 = vector.broadcast %cst_58 : f32 to vector<8x1xf32>
    %90 = arith.addf %86, %89 : vector<8x1xf32>
    %91 = math.rsqrt %90 : vector<8x1xf32>
    %92 = arith.mulf %88, %91 : vector<8x1xf32>
    %c0_59 = arith.constant 0 : index
    %c8_60 = arith.constant 8 : index
    %c0_61 = arith.constant 0 : index
    %93 = vector.load %arg3[%c0_59, %c8_60, %c0_61] : memref<1x16x1xf32, #tpu.memory_space<vmem>>, vector<1x8x1xf32>
    %94 = vector.shape_cast %93 : vector<1x8x1xf32> to vector<8x1xf32>
    %95 = arith.mulf %82, %92 : vector<8x1xf32>
    %96 = arith.subf %94, %95 : vector<8x1xf32>
    %97 = vector.broadcast %92 : vector<8x1xf32> to vector<8x288xf32>
    %98 = arith.mulf %52, %97 : vector<8x288xf32>
    %99 = vector.broadcast %96 : vector<8x1xf32> to vector<8x288xf32>
    %100 = arith.addf %98, %99 : vector<8x288xf32>
    %cst_62 = arith.constant 0.000000e+00 : f32
    %101 = vector.broadcast %cst_62 : f32 to vector<8x288xf32>
    %102 = arith.cmpf ogt, %100, %101 : vector<8x288xf32>
    %cst_63 = arith.constant 2.000000e-01 : f32
    %103 = vector.broadcast %cst_63 : f32 to vector<8x288xf32>
    %104 = arith.mulf %103, %100 : vector<8x288xf32>
    %105 = arith.select %102, %100, %104 : vector<8x288xi1>, vector<8x288xf32>
    %c0_64 = arith.constant 0 : index
    %c0_65 = arith.constant 0 : index
    %c0_66 = arith.constant 0 : index
    %106 = vector.load %arg4[%c0_64, %c0_65, %c0_66] : memref<1x8x288xf32, #tpu.memory_space<vmem>>, vector<1x8x288xf32>
    %107 = vector.shape_cast %106 : vector<1x8x288xf32> to vector<8x288xf32>
    %108 = vector.shape_cast %105 : vector<8x288xf32> to vector<1x8x288xf32>
    tpu.vector_store %arg4[%c0_64, %c0_65, %c0_66], %108 {strides = array<i32>} : memref<1x8x288xf32, #tpu.memory_space<vmem>>, vector<1x8x288xf32>,
    return
  }
  func.func @transform_0(%arg0: i32) -> (i32, i32, i32) {
    %c0_i32 = arith.constant 0 : i32
    %c0_i32_0 = arith.constant 0 : i32
    %c0_i32_1 = arith.constant 0 : i32
    return %arg0, %c0_i32, %c0_i32_0 : i32, i32, i32
  }
  func.func @transform_1(%arg0: i32) -> (i32, i32, i32) {
    %c0_i32 = arith.constant 0 : i32
    %c0_i32_0 = arith.constant 0 : i32
    %c0_i32_1 = arith.constant 0 : i32
    %c0_i32_2 = arith.constant 0 : i32
    return %c0_i32, %c0_i32_0, %c0_i32_1 : i32, i32, i32
  }
  func.func @transform_2(%arg0: i32) -> (i32, i32, i32) {
    %c0_i32 = arith.constant 0 : i32
    %c0_i32_0 = arith.constant 0 : i32
    %c0_i32_1 = arith.constant 0 : i32
    return %arg0, %c0_i32, %c0_i32_0 : i32, i32, i32
  }
  func.func @transform_3(%arg0: i32) -> (i32, i32, i32) {
    %c0_i32 = arith.constant 0 : i32
    %c0_i32_0 = arith.constant 0 : i32
    %c0_i32_1 = arith.constant 0 : i32
    return %arg0, %c0_i32, %c0_i32_0 : i32, i32, i32
  }
}

</mosaic_0001>

<bundles_post_ra>
// kernel: conv_adain_block.1
= control target key start
LH: loop header
LB: loop body
LE: loop exit
PB: predicated region body
PF: predicated region fallthrough
CT: control target
= control target key end

     0   :  { %s1668_s12 = smov 0   ;;  %s1903_s0 = inlined_call_operand.vmem [shape: bf16[2,4,384], index: 0, kind: input, shape index: {}]   ;;  %s1904_s1 = inlined_call_operand.vmem [shape: bf16[9,8,4], index: 1, kind: input, shape index: {}]   ;;  %s1905_s2 = inlined_call_operand.vmem [shape: f32[2,16,1], index: 2, kind: input, shape index: {}]   ;;  %s1906_s3 = inlined_call_operand.vmem [shape: f32[2,8,288], index: 3, kind: output, shape index: {}]  }
   0x1 LB: > { %s1469_s13 = sadd.s32 4294967295, %s1634_s12   ;;  %p1473_p0 = scmp.ge.s32.totalorder %s1634_s12, 1  ;;  %s1634_s12 = sphi %s1668_s12, %s13_s12  }
   0x2   : > { %p147_p1 = scmp.lt.s32.totalorder %s1634_s12, 3 }
   0x4   : > { %p148_p2 = pnand %p1473_p0, %p147_p1 }
   0x5   : > { %p176_p3 = scmp.lt.s32.totalorder (!%p148_p2), %s1469_s13, 1  ;;  %s1640_s18 = smov (!%p148_p2), 127  }
   0x6   : > { %151 = sbr.rel (%p148_p2) target bundleno = 707 (0x2c3), region = 32  ;;  %s1641_s19 = smov (!%p148_p2), 126  }
   0x7   : > { %s1642_s20 = smov (!%p148_p2), 110   ;;  %s1643_s21 = smov (!%p148_p2), 109  }
   0x8   : > { %s1644_s22 = smov (!%p148_p2), 108   ;;  %s1645_s23 = smov (!%p148_p2), 92  }
   0x9   : > { %s1646_s24 = smov (!%p148_p2), 91   ;;  %s1647_s25 = smov (!%p148_p2), 90  }
   0xb   : > { %v201_v0 = vlaneseq  ;;  %v1636_v1 = vmov 1983009808   ;;  %v1637_v3 = vmov 0.0   ;;  %s1914_s13 = smov (!%p176_p3, %s1469_s13), 1  ;;  %vm1638_vm0 = vmmov 0  }
   0xc   : > { %v199_v2 = vunpack.c.l.s4 %v1636_v1  ;;  %1534 = vmatprep.subr.bf16.mxu1 %v1637_v3  ;;  %1536 = vmatprep.mubr.msk.bf16.mxu1 %vm1638_vm0, %v1637_v3  ;;  %s1588_s14 = smul.u32 6, %s1914_s13  ;;  %v1639_v6 = vmov 0   ;;  %vm226_vm1 = vcmask 1041408   ;;  %vm219_vm2 = vcmask 1039360   ;;  %v1478_v52 = vld [vmem:[%s1904_s1 + $0x4] sm:$0xf] }
   0xd   : > { %v202_v4 = vshrl.u32 %v201_v0, 7  ;;  %268 = vmatprep.mubr.bf16.mxu0 %v1639_v6  ;;  %1616 = vset.pattern.permute.xlu0 %v1639_v6  ;;  %vm222_vm3 = vcmask 31744   ;;  %vm436_vm4 = vcmask 1031168   ;;  %v192_v62 = vld [vmem:[%s1904_s1] sm:$0xf]  ;;  %vm561_vm5 = vcmask 900096  }
   0xe   : > { %v200_v5 = vunpack.c.0.s8 %v199_v2  ;;  %1617 = vset.pattern.permute.xlu1 %v1639_v6  ;;  %s1691_s17 = scalar_lea.vmem %s1903_s0, %s1588_s14  ;;  %vm686_vm6 = vcmask 891904   ;;  %vm811_vm7 = vcmask 883712   ;;  %vm936_vm8 = vcmask 752640  }
   0xf   : > { %v193_v8 = vld [vmem:[%s1691_s17] sm:$0x3f]  ;;  %vm1061_vm9 = vcmask 744448   ;;  %vm1186_vm10 = vcmask 736256  }
  0x10   : > { %v1685_v7 = vsub.s32 %v200_v5, %v202_v4  ;;  %v197_v10 = vcombine.high %v193_v8, %v193_v8  ;;  %v412_v11 = vld [vmem:[%s1691_s17] sm:$0x3f] }
  0x11   : > { %v414_v15 = vcombine.high %v412_v11, %v412_v11  ;;  %v537_v17 = vld [vmem:[%s1691_s17] sm:$0x3f] }
  0x12   : > { %v1695_v9 = vrot.slane %v193_v8, %v1685_v7  ;;  %v1700_v12 = vrot.slane %v197_v10, %v1685_v7  ;;  %v421_v14 = vrot.slane %v412_v11, %v1685_v7  ;;  %v546_v19 = vrot.slane %v537_v17, %v1685_v7  ;;  %v662_v22 = vld [vmem:[%s1691_s17] sm:$0x3f]  ;;  %v1485_v10 = vld [vmem:[%s1904_s1 + $0x8] sm:$0xf] }
  0x13   : > { %v428_v18 = vrot.slane %v414_v15, %v1685_v7  ;;  %v539_v20 = vcombine.high %v537_v17, %v537_v17  ;;  %v671_v24 = vrot.slane %v662_v22, %v1685_v7  ;;  %v664_v25 = vcombine.high %v662_v22, %v662_v22  ;;  %v787_v27 = vld [vmem:[%s1691_s17] sm:$0x3f] }
  0x14   : > { %213 = vrot.lane.b32.xlu0 %v1695_v9, %s1640_s18  ;;  %v1704_v13 = vcombine.high %v1695_v9, %v1695_v9  ;;  %217 = vrot.lane.b32.xlu1 %v1700_v12, %s1640_s18  ;;  %v429_v16 = vcombine.high %v421_v14, %v421_v14  ;;  %v554_v21 = vcombine.high %v546_v19, %v546_v19  ;;  %v912_v32 = vld [vmem:[%s1691_s17] sm:$0x3f]  ;;  %v327_v55 = vsel %vm226_vm1, %v1700_v12, 0 }
  0x15   : > { %v553_v23 = vrot.slane %v539_v20, %v1685_v7  ;;  %v679_v26 = vcombine.high %v671_v24, %v671_v24  ;;  %v678_v28 = vrot.slane %v664_v25, %v1685_v7  ;;  %v796_v29 = vrot.slane %v787_v27, %v1685_v7  ;;  %v1037_v37 = vld [vmem:[%s1691_s17] sm:$0x3f] }
  0x16   : > { %v789_v30 = vcombine.high %v787_v27, %v787_v27  ;;  %v921_v34 = vrot.slane %v912_v32, %v1685_v7  ;;  %v914_v35 = vcombine.high %v912_v32, %v912_v32  ;;  %v1046_v39 = vrot.slane %v1037_v37, %v1685_v7  ;;  %v1162_v42 = vld [vmem:[%s1691_s17] sm:$0x3f]  ;;  %v1493_v27 = vld [vmem:[%s1904_s1 + $0x10] sm:$0xf] }
  0x17   : > { %v804_v31 = vcombine.high %v796_v29, %v796_v29  ;;  %v1039_v40 = vcombine.high %v1037_v37, %v1037_v37  ;;  %v1171_v44 = vrot.slane %v1162_v42, %v1685_v7  ;;  %v1164_v45 = vcombine.high %v1162_v42, %v1162_v42  ;;  %v1501_v42 = vld [vmem:[%s1904_s1 + $0x18] sm:$0xf] }
  0x18   : > { %215 = vrot.lane.b32.xlu0 %v1704_v13, %s1640_s18  ;;  %430 = vrot.lane.b32.xlu1 %v421_v14, %s1641_s19  ;;  %v803_v33 = vrot.slane %v789_v30, %v1685_v7  ;;  %v929_v36 = vcombine.high %v921_v34, %v921_v34  ;;  %v928_v38 = vrot.slane %v914_v35, %v1685_v7  ;;  %v321_v58 = vsel %vm226_vm1, %v1695_v9, 0  ;;  %v1497_v35 = vld [vmem:[%s1904_s1 + $0x14] sm:$0xf] }
  0x19   : > { %v1054_v41 = vcombine.high %v1046_v39, %v1046_v39  ;;  %v1053_v43 = vrot.slane %v1039_v40, %v1685_v7  ;;  %v1179_v46 = vcombine.high %v1171_v44, %v1171_v44  ;;  %v1178_v47 = vrot.slane %v1164_v45, %v1685_v7 }
  0x1c   : > { %432 = vrot.lane.b32.xlu0 %v429_v16, %s1641_s19  ;;  %434 = vrot.lane.b32.xlu1 %v428_v18, %s1641_s19  ;;  %s1515_s19 = sshll.u32 %s1914_s13, 4 }
  0x20   : > { %555 = vrot.lane.b32.xlu0 %v546_v19, %s1642_s20  ;;  %557 = vrot.lane.b32.xlu1 %v554_v21, %s1642_s20  ;;  %v1489_v19 = vld [vmem:[%s1904_s1 + $0xc] sm:$0xf] }
  0x24   : > { %559 = vrot.lane.b32.xlu0 %v553_v23, %s1642_s20  ;;  %680 = vrot.lane.b32.xlu1 %v671_v24, %s1643_s21 }
  0x28   : > { %682 = vrot.lane.b32.xlu0 %v679_v26, %s1643_s21  ;;  %684 = vrot.lane.b32.xlu1 %v678_v28, %s1643_s21 }
  0x2c   : > { %805 = vrot.lane.b32.xlu0 %v796_v29, %s1644_s22  ;;  %807 = vrot.lane.b32.xlu1 %v804_v31, %s1644_s22 }
  0x30   : > { %809 = vrot.lane.b32.xlu0 %v803_v33, %s1644_s22  ;;  %930 = vrot.lane.b32.xlu1 %v921_v34, %s1645_s23  ;;  %s185_s22 = scalar_lea.vmem %s1905_s2, %s1515_s19 }
  0x34   : > { %932 = vrot.lane.b32.xlu0 %v929_v36, %s1645_s23  ;;  %934 = vrot.lane.b32.xlu1 %v928_v38, %s1645_s23  ;;  %s1589_s23 = smul.u32 24, %s1914_s13 }
  0x36   : > { %s190_s26 = scalar_lea.vmem %s1906_s3, %s1589_s23 }
  0x38   : > { %1055 = vrot.lane.b32.xlu0 %v1046_v39, %s1646_s24  ;;  %1057 = vrot.lane.b32.xlu1 %v1054_v41, %s1646_s24 }
  0x3c   : > { %1059 = vrot.lane.b32.xlu0 %v1053_v43, %s1646_s24  ;;  %1180 = vrot.lane.b32.xlu1 %v1171_v44, %s1647_s25 }
  0x40   : > { %1182 = vrot.lane.b32.xlu0 %v1179_v46, %s1647_s25  ;;  %1184 = vrot.lane.b32.xlu1 %v1178_v47, %s1647_s25 }
  0x86   : > { %v214_v48 = vpop.permute.xlu0 %213  ;;  %v218_v49 = vpop.permute.xlu1 %217 }
  0x87   : > { %v234_v50 = vsel %vm226_vm1, %v218_v49, 0 }
  0x88   : > { %1535 = vmatpush3.bf16.msra.mxu1 %v234_v50 }
  0x89   : > { %1540 = vmatprep.subr.bf16.mxu1 %v1637_v3 }
  0x8a   : > { %v216_v51 = vpop.permute.xlu0 %215  ;;  %v431_v57 = vpop.permute.xlu1 %430 }
  0x8b   : > { %v221_v53 = vsel %vm219_vm2, %v216_v51, %v218_v49  ;;  %v220_v54 = vsel %vm219_vm2, %v214_v48, %v216_v51  ;;  %1537 = vmatmul.mubr.msk.bf16.vlgmr.msra.gmra.mxu1 %vm222_vm3, %v1478_v52  ;;  %v1505_v49 = vld [vmem:[%s1904_s1 + $0x1c] sm:$0xf] }
  0x8c   : > { %1479 = vmatprep.subr.msk.bf16.mxu0 %vm226_vm1, %v221_v53  ;;  %v228_v56 = vsel %vm226_vm1, %v220_v54, 0  ;;  %1541 = vmatpush3.bf16.msra.mxu1 %v327_v55  ;;  %v1509_v53 = vld [vmem:[%s1904_s1 + $0x20] sm:$0xf] }
  0x8d   : > { %251 = vmatpush1.bf16.msra.mxu0 %v228_v56  ;;  %1542 = vmatprep.mubr.msk.bf16.mxu1 %vm1638_vm0, %v1637_v3 }
  0x8e   : > { %1482 = vmatprep.subr.msk.bf16.mxu0 %vm226_vm1, %v1704_v13  ;;  %v433_v59 = vpop.permute.xlu0 %432  ;;  %1546 = vmatprep.subr.bf16.mxu1 %v1637_v3  ;;  %v435_v60 = vpop.permute.xlu1 %434 }
  0x8f   : > { %v438_v61 = vsel %vm436_vm4, %v433_v59, %v435_v60  ;;  %v437_v1 = vsel %vm436_vm4, %v431_v57, %v433_v59  ;;  %v449_v2 = vsel %vm226_vm1, %v435_v60, 0 }
  0x90   : > { %1480 = vmatmul.mubr.msk.bf16.vlgmr.msra.gmra.mxu0 %vm222_vm3, %v1478_v52  ;;  %v443_v5 = vsel %vm226_vm1, %v437_v1, 0 }
  0x91   : > { %344 = vmatpush1.bf16.msra.mxu0 %v321_v58  ;;  %361 = vmatprep.mubr.bf16.mxu0 %v1639_v6 }
  0x92   : > { %1486 = vmatprep.subr.msk.bf16.mxu0 %vm226_vm1, %v438_v61  ;;  %v556_v63 = vpop.permute.xlu0 %555  ;;  %v558_v4 = vpop.permute.xlu1 %557 }
  0x93   : > { %1543 = vmatmul.mubr.msk.bf16.vlgmr.msra.gmra.mxu1 %vm222_vm3, %v192_v62  ;;  %v562_v12 = vsel %vm561_vm5, %v556_v63, %v558_v4 }
  0x94   : > { %1547 = vmatpush3.bf16.msra.mxu1 %v449_v2  ;;  %1548 = vmatprep.mubr.msk.bf16.mxu1 %vm1638_vm0, %v1637_v3  ;;  %v568_v15 = vsel %vm226_vm1, %v562_v12, 0 }
  0x95   : > { %1552 = vmatprep.subr.bf16.mxu1 %v1637_v3 }
  0x96   : > { %v560_v7 = vpop.permute.xlu0 %559  ;;  %v681_v9 = vpop.permute.xlu1 %680 }
  0x97   : > { %v563_v8 = vsel %vm561_vm5, %v558_v4, %v560_v7  ;;  %v574_v13 = vsel %vm226_vm1, %v560_v7, 0 }
  0x98   : > { %1483 = vmatmul.mubr.msk.bf16.vlgmr.msra.gmra.mxu0 %vm222_vm3, %v192_v62 }
  0x99   : > { %466 = vmatpush1.bf16.msra.mxu0 %v443_v5  ;;  %483 = vmatprep.mubr.bf16.mxu0 %v1639_v6 }
  0x9a   : > { %1490 = vmatprep.subr.msk.bf16.mxu0 %vm226_vm1, %v563_v8  ;;  %v683_v11 = vpop.permute.xlu0 %682  ;;  %v685_v14 = vpop.permute.xlu1 %684 }
  0x9b   : > { %1549 = vmatmul.mubr.msk.bf16.vlgmr.msra.gmra.mxu1 %vm222_vm3, %v1485_v10  ;;  %v688_v17 = vsel %vm686_vm6, %v683_v11, %v685_v14  ;;  %v687_v20 = vsel %vm686_vm6, %v681_v9, %v683_v11  ;;  %v699_v21 = vsel %vm226_vm1, %v685_v14, 0 }
  0x9c   : > { %1553 = vmatpush3.bf16.msra.mxu1 %v574_v13  ;;  %1554 = vmatprep.mubr.msk.bf16.mxu1 %vm1638_vm0, %v1637_v3  ;;  %v693_v23 = vsel %vm226_vm1, %v687_v20, 0  ;;  %v1286_v20 = vand.u32 127, %v201_v0 }
  0x9d   : > { %1558 = vmatprep.subr.bf16.mxu1 %v1637_v3 }
  0x9e   : > { %v806_v16 = vpop.permute.xlu0 %805  ;;  %v808_v18 = vpop.permute.xlu1 %807 }
  0x9f   : > { %v812_v28 = vsel %vm811_vm7, %v806_v16, %v808_v18 }
  0xa0   : > { %1487 = vmatmul.mubr.msk.bf16.vlgmr.msra.gmra.mxu0 %vm222_vm3, %v1485_v10  ;;  %v818_v31 = vsel %vm226_vm1, %v812_v28, 0 }
  0xa1   : > { %591 = vmatpush1.bf16.msra.mxu0 %v568_v15  ;;  %608 = vmatprep.mubr.bf16.mxu0 %v1639_v6 }
  0xa2   : > { %1494 = vmatprep.subr.msk.bf16.mxu0 %vm226_vm1, %v688_v17  ;;  %v810_v22 = vpop.permute.xlu0 %809  ;;  %v931_v24 = vpop.permute.xlu1 %930 }
  0xa3   : > { %1555 = vmatmul.mubr.msk.bf16.vlgmr.msra.gmra.mxu1 %vm222_vm3, %v1489_v19  ;;  %v813_v25 = vsel %vm811_vm7, %v808_v18, %v810_v22  ;;  %v824_v29 = vsel %vm226_vm1, %v810_v22, 0  ;;  %vm1350_vm7 = vcmask 261120  }
  0xa4   : > { %1559 = vmatpush3.bf16.msra.mxu1 %v699_v21  ;;  %1560 = vmatprep.mubr.msk.bf16.mxu1 %vm1638_vm0, %v1637_v3 }
  0xa5   : > { %1564 = vmatprep.subr.bf16.mxu1 %v1637_v3 }
  0xa6   : > { %v933_v26 = vpop.permute.xlu0 %932  ;;  %v935_v30 = vpop.permute.xlu1 %934 }
  0xa7   : > { %v938_v33 = vsel %vm936_vm8, %v933_v26, %v935_v30  ;;  %v937_v36 = vsel %vm936_vm8, %v931_v24, %v933_v26  ;;  %v949_v37 = vsel %vm226_vm1, %v935_v30, 0 }
  0xa8   : > { %1491 = vmatmul.mubr.msk.bf16.vlgmr.msra.gmra.mxu0 %vm222_vm3, %v1489_v19  ;;  %v943_v39 = vsel %vm226_vm1, %v937_v36, 0 }
  0xa9   : > { %716 = vmatpush1.bf16.msra.mxu0 %v693_v23  ;;  %733 = vmatprep.mubr.bf16.mxu0 %v1639_v6 }
  0xaa   : > { %1498 = vmatprep.subr.msk.bf16.mxu0 %vm226_vm1, %v813_v25  ;;  %v1056_v32 = vpop.permute.xlu0 %1055  ;;  %v1058_v34 = vpop.permute.xlu1 %1057  ;;  %v1288_v25 = vadd.s32 256, %v1286_v20 }
  0xab   : > { %1561 = vmatmul.mubr.msk.bf16.vlgmr.msra.gmra.mxu1 %vm222_vm3, %v1493_v27  ;;  %v1062_v43 = vsel %vm1061_vm9, %v1056_v32, %v1058_v34 }
  0xac   : > { %1565 = vmatpush3.bf16.msra.mxu1 %v824_v29  ;;  %1566 = vmatprep.mubr.msk.bf16.mxu1 %vm1638_vm0, %v1637_v3  ;;  %v1068_v47 = vsel %vm226_vm1, %v1062_v43, 0  ;;  %v1287_v29 = vadd.s32 128, %v1286_v20 }
  0xad   : > { %1570 = vmatprep.subr.bf16.mxu1 %v1637_v3 }
  0xae   : > { %v1060_v38 = vpop.permute.xlu0 %1059  ;;  %v1181_v40 = vpop.permute.xlu1 %1180 }
  0xaf   : > { %v1063_v41 = vsel %vm1061_vm9, %v1058_v34, %v1060_v38  ;;  %v1074_v44 = vsel %vm226_vm1, %v1060_v38, 0 }
  0xb0   : > { %1495 = vmatmul.mubr.msk.bf16.vlgmr.msra.gmra.mxu0 %vm222_vm3, %v1493_v27 }
  0xb1   : > { %841 = vmatpush1.bf16.msra.mxu0 %v818_v31  ;;  %858 = vmatprep.mubr.bf16.mxu0 %v1639_v6  ;;  %v1852_v31 = vmul.u32.u64.low 3817748708, %v1288_v25  ;;  %v1853_v32 = vmul.u32.u64.high 3817748708, %v1288_v25, %v1852_v31 }
  0xb2   : > { %1502 = vmatprep.subr.msk.bf16.mxu0 %vm226_vm1, %v938_v33  ;;  %v1183_v45 = vpop.permute.xlu0 %1182  ;;  %v1185_v46 = vpop.permute.xlu1 %1184 }
  0xb3   : > { %1567 = vmatmul.mubr.msk.bf16.vlgmr.msra.gmra.mxu1 %vm222_vm3, %v1497_v35  ;;  %v1188_v48 = vsel %vm1186_vm10, %v1183_v45, %v1185_v46  ;;  %v1187_v50 = vsel %vm1186_vm10, %v1181_v40, %v1183_v45  ;;  %v1199_v51 = vsel %vm226_vm1, %v1185_v46, 0 }
  0xb4   : > { %1571 = vmatpush3.bf16.msra.mxu1 %v949_v37  ;;  %1572 = vmatprep.mubr.msk.bf16.mxu1 %vm1638_vm0, %v1637_v3  ;;  %v1193_v52 = vsel %vm226_vm1, %v1187_v50, 0  ;;  %v1858_v37 = vmul.u32.u64.low 3817748708, %v1287_v29  ;;  %v1859_v38 = vmul.u32.u64.high 3817748708, %v1287_v29, %v1858_v37 }
  0xb5   : > { %1576 = vmatprep.subr.bf16.mxu1 %v1637_v3 }
  0xb8   : > { %1499 = vmatmul.mubr.msk.bf16.vlgmr.msra.gmra.mxu0 %vm222_vm3, %v1497_v35  ;;  %v1855_v34 = vmul.u32.u64.low 3817748708, %v1286_v20  ;;  %v1856_v35 = vmul.u32.u64.high 3817748708, %v1286_v20, %v1855_v34 }
  0xb9   : > { %966 = vmatpush1.bf16.msra.mxu0 %v943_v39  ;;  %983 = vmatprep.mubr.bf16.mxu0 %v1639_v6 }
  0xba   : > { %1506 = vmatprep.subr.msk.bf16.mxu0 %vm226_vm1, %v1063_v41  ;;  %v1295_v46 = vshrl.u32 %v1856_v35, 4 }
  0xbb   : > { %1573 = vmatmul.mubr.msk.bf16.vlgmr.msra.gmra.mxu1 %vm222_vm3, %v1501_v42 }
  0xbc   : > { %1577 = vmatpush3.bf16.msra.mxu1 %v1074_v44  ;;  %1578 = vmatprep.mubr.msk.bf16.mxu1 %vm1638_vm0, %v1637_v3  ;;  %v1317_v44 = vshrl.u32 %v1853_v32, 4 }
  0xbd   : > { %1582 = vmatprep.subr.bf16.mxu1 %v1637_v3 }
  0xc0   : > { %1503 = vmatmul.mubr.msk.bf16.vlgmr.msra.gmra.mxu0 %vm222_vm3, %v1501_v42 }
  0xc1   : > { %1091 = vmatpush1.bf16.msra.mxu0 %v1068_v47  ;;  %1108 = vmatprep.mubr.bf16.mxu0 %v1639_v6 }
  0xc2   : > { %1510 = vmatprep.subr.msk.bf16.mxu0 %vm226_vm1, %v1188_v48 }
  0xc3   : > { %1579 = vmatmul.mubr.msk.bf16.vlgmr.msra.gmra.mxu1 %vm222_vm3, %v1505_v49 }
  0xc4   : > { %1583 = vmatpush3.bf16.msra.mxu1 %v1199_v51  ;;  %1584 = vmatprep.mubr.msk.bf16.mxu1 %vm1638_vm0, %v1637_v3  ;;  %v1318_v51 = vmul.u32 18, %v1317_v44 }
  0xc8   : > { %1507 = vmatmul.mubr.msk.bf16.vlgmr.msra.gmra.mxu0 %vm222_vm3, %v1505_v49  ;;  %v1306_v49 = vshrl.u32 %v1859_v38, 4 }
  0xc9   : > { %1216 = vmatpush1.bf16.msra.mxu0 %v1193_v52  ;;  %1233 = vmatprep.mubr.bf16.mxu0 %v1639_v6 }
  0xcb   : > { %1585 = vmatmul.mubr.msk.bf16.vlgmr.msra.gmra.mxu1 %vm222_vm3, %v1509_v53 }
  0xd0   : > { %1511 = vmatmul.mubr.msk.bf16.vlgmr.msra.gmra.mxu0 %vm222_vm3, %v1509_v53  ;;  %v1296_v53 = vmul.u32 18, %v1295_v46 }
 0x14b   : > { %v1837_v54 = vpop.f32.mrf.mxu1 }
 0x14d   : > { %v1538_v55 = vpop.f32.mrf.mxu1 }
 0x14f   : > { %v314_v57 = vpop.f32.mrf.mxu1 }
 0x150   : > { %v1839_v56 = vpop.f32.mrf.mxu0 }
 0x151   : > { %v1539_v58 = vpop.f32.mrf.mxu1 }
 0x152   : > { %v1841_v3 = vpop.f32.mrf.mxu0 }
 0x153   : > { %v404_v60 = vpop.f32.mrf.mxu1 }
 0x154   : > { %v274_v59 = vpop.f32.mrf.mxu0  ;;  %v405_v55 = vadd.f32 %v404_v60, %v1837_v54 }
 0x155   : > { %v1544_v61 = vpop.f32.mrf.mxu1  ;;  %v1307_v59 = vmul.u32 18, %v1306_v49 }
 0x156   : > { %v275_v6 = vpop.f32.mrf.mxu0 }
 0x157   : > { %v407_v63 = vpop.f32.mrf.mxu1 }
 0x158   : > { %v363_v62 = vpop.f32.mrf.mxu0  ;;  %v1319_v63 = vsub.s32 %v1288_v25, %v1318_v51 }
 0x159   : > { %v1545_v2 = vpop.f32.mrf.mxu1 }
 0x15a   : > { %v1843_v1 = vpop.f32.mrf.mxu0  ;;  %v364_v2 = vadd.f32 %v363_v62, %v1839_v56  ;;  %vm1324_vm11 = vcmp.ne.s32.totalorder %v1319_v63, 0  ;;  %vm1327_vm12 = vcmp.lt.s32.totalorder %v1319_v63, 0 }
 0x15b   : > { %v526_v5 = vpop.f32.mrf.mxu1  ;;  %vm1870_vm15 = vmand %vm1327_vm12, %vm1324_vm11 }
 0x15c   : > { %v367_v4 = vpop.f32.mrf.mxu0  ;;  %v534_v6 = vadd.f32 %v526_v5, %v405_v55 }
 0x15d   : > { %v1550_v8 = vpop.f32.mrf.mxu1 }
 0x15e   : > { %v368_v7 = vpop.f32.mrf.mxu0 }
 0x15f   : > { %v529_v10 = vpop.f32.mrf.mxu1  ;;  %v1297_v7 = vsub.s32 %v1286_v20, %v1296_v53 }
 0x160   : > { %v485_v9 = vpop.f32.mrf.mxu0 }
 0x161   : > { %v1551_v12 = vpop.f32.mrf.mxu1  ;;  %vm1322_vm13 = vcmp.ne.s32.totalorder %v1297_v7, 0  ;;  %vm1325_vm14 = vcmp.lt.s32.totalorder %v1297_v7, 0  ;;  %v1331_v20 = vadd.s32 18, %v1297_v7 }
 0x162   : > { %v1845_v11 = vpop.f32.mrf.mxu0  ;;  %v366_v12 = vadd.f32 %v1843_v1, %v1841_v3  ;;  %vm1874_vm2 = vmand %vm1325_vm14, %vm1322_vm13 }
 0x163   : > { %v651_v14 = vpop.f32.mrf.mxu1  ;;  %v1334_v35 = vsel %vm1874_vm2, %v1331_v20, %v1297_v7 }
 0x164   : > { %v489_v13 = vpop.f32.mrf.mxu0  ;;  %v659_v8 = vadd.f32 %v651_v14, %v534_v6  ;;  %v533_v60 = vadd.f32 %v1845_v11, %v366_v12  ;;  %v1333_v14 = vadd.s32 18, %v1319_v63  ;;  %vm1337_vm5 = vcmp.lt.s32.totalorder %v1334_v35, 16 }
 0x165   : > { %v1556_v16 = vpop.f32.mrf.mxu1  ;;  %v532_v13 = vadd.f32 %v485_v9, %v364_v2 }
 0x166   : > { %v490_v15 = vpop.f32.mrf.mxu0  ;;  %v1308_v16 = vsub.s32 %v1287_v29, %v1307_v59  ;;  %v1336_v29 = vsel %vm1870_vm15, %v1333_v14, %v1319_v63 }
 0x167   : > { %v654_v18 = vpop.f32.mrf.mxu1  ;;  %vm1339_vm4 = vcmp.lt.s32.totalorder %v1336_v29, 16 }
 0x168   : > { %v610_v17 = vpop.f32.mrf.mxu0  ;;  %vm1323_vm0 = vcmp.ne.s32.totalorder %v1308_v16, 0  ;;  %vm1326_vm1 = vcmp.lt.s32.totalorder %v1308_v16, 0 }
 0x169   : > { %v1557_v21 = vpop.f32.mrf.mxu1  ;;  %v657_v5 = vadd.f32 %v610_v17, %v532_v13  ;;  %vm1881_vm3 = vmand %vm1326_vm1, %vm1323_vm0 }
 0x16a   : > { %v1847_v19 = vpop.f32.mrf.mxu0 }
 0x16b   : > { %v776_v23 = vpop.f32.mrf.mxu1 }
 0x16c   : > { %v614_v22 = vpop.f32.mrf.mxu0  ;;  %v784_v18 = vadd.f32 %v776_v23, %v659_v8 }
 0x16d   : > { %v1562_v26 = vpop.f32.mrf.mxu1  ;;  %v658_v22 = vadd.f32 %v1847_v19, %v533_v60 }
 0x16e   : > { %v615_v24 = vpop.f32.mrf.mxu0 }
 0x16f   : > { %v779_v28 = vpop.f32.mrf.mxu1 }
 0x170   : > { %v735_v27 = vpop.f32.mrf.mxu0  ;;  %v1332_v28 = vadd.s32 18, %v1308_v16 }
 0x171   : > { %v1563_v33 = vpop.f32.mrf.mxu1  ;;  %v782_v3 = vadd.f32 %v735_v27, %v657_v5 }
 0x172   : > { %v1850_v30 = vpop.f32.mrf.mxu0 }
 0x173   : > { %v901_v0 = vpop.f32.mrf.mxu1  ;;  %v783_v24 = vadd.f32 %v1850_v30, %v658_v22 }
 0x174   : > { %v739_v36 = vpop.f32.mrf.mxu0  ;;  %v909_v56 = vadd.f32 %v901_v0, %v784_v18 }
 0x175   : > { %v1568_v40 = vpop.f32.mrf.mxu1 }
 0x176   : > { %v740_v39 = vpop.f32.mrf.mxu0 }
 0x177   : > { %v904_v42 = vpop.f32.mrf.mxu1  ;;  %v1335_v39 = vsel %vm1881_vm3, %v1332_v28, %v1308_v16 }
 0x178   : > { %v860_v41 = vpop.f32.mrf.mxu0  ;;  %vm1338_vm6 = vcmp.lt.s32.totalorder %v1335_v39, 16 }
 0x179   : > { %v1569_v45 = vpop.f32.mrf.mxu1  ;;  %v907_v25 = vadd.f32 %v860_v41, %v782_v3 }
 0x17a   : > { %v862_v43 = vpop.f32.mrf.mxu0 }
 0x17b   : > { %v1026_v48 = vpop.f32.mrf.mxu1  ;;  %v908_v32 = vadd.f32 %v862_v43, %v783_v24 }
 0x17c   : > { %v864_v47 = vpop.f32.mrf.mxu0  ;;  %v1034_v23 = vadd.f32 %v1026_v48, %v909_v56 }
 0x17d   : > { %v1574_v52 = vpop.f32.mrf.mxu1 }
 0x17e   : > { %v865_v50 = vpop.f32.mrf.mxu0 }
 0x17f   : > { %v1029_v58 = vpop.f32.mrf.mxu1 }
 0x180   : > { %v985_v57 = vpop.f32.mrf.mxu0 }
 0x181   : > { %v1575_v4 = vpop.f32.mrf.mxu1  ;;  %v1032_v33 = vadd.f32 %v985_v57, %v907_v25 }
 0x182   : > { %v987_v61 = vpop.f32.mrf.mxu0 }
 0x183   : > { %v1151_v15 = vpop.f32.mrf.mxu1  ;;  %v1033_v0 = vadd.f32 %v987_v61, %v908_v32 }
 0x184   : > { %v989_v10 = vpop.f32.mrf.mxu0  ;;  %v1159_v19 = vadd.f32 %v1151_v15, %v1034_v23  ;;  %v1367_v15 = vld [vmem:[%s185_s22] sm:$0xff] }
 0x185   : > { %v1580_v21 = vpop.f32.mrf.mxu1 }
 0x186   : > { %v990_v54 = vpop.f32.mrf.mxu0 }
 0x187   : > { %v1154_v1 = vpop.f32.mrf.mxu1  ;;  %v1371_v54 = vld [vmem:[%s185_s22 + $0x8] sm:$0xff] }
 0x188   : > { %v1110_v62 = vpop.f32.mrf.mxu0 }
 0x189   : > { %v1581_v26 = vpop.f32.mrf.mxu1  ;;  %v1157_v37 = vadd.f32 %v1110_v62, %v1032_v33 }
 0x18a   : > { %v1112_v11 = vpop.f32.mrf.mxu0 }
 0x18b   : > { %v1276_v34 = vpop.f32.mrf.mxu1  ;;  %v1158_v41 = vadd.f32 %v1112_v11, %v1033_v0 }
 0x18c   : > { %v1114_v27 = vpop.f32.mrf.mxu0  ;;  %v1284_v36 = vadd.f32 %v1276_v34, %v1159_v19 }
 0x18d   : > { %v1586_v38 = vpop.f32.mrf.mxu1 }
 0x18e   : > { %v1115_v30 = vpop.f32.mrf.mxu0  ;;  %v1348_v43 = vsel %vm1339_vm4, %v1284_v36, 0.0 }
 0x18f   : > { %v1279_v44 = vpop.f32.mrf.mxu1  ;;  %v1357_v50 = vmul.f32 %v1348_v43, %v1348_v43  ;;  %v1351_v58 = vsel %vm1350_vm7, %v1348_v43, 0.0 }
 0x190   : > { %v1235_v40 = vpop.f32.mrf.mxu0 }
 0x191   : > { %v1282_v42 = vadd.f32 %v1235_v40, %v1157_v37  ;;  %v1587_v48 = vpop.f32.mrf.mxu1  ;;  %v1359_v61 = vsel %vm1350_vm7, %v1357_v50, 0.0 }
 0x192   : > { %v1237_v45 = vpop.f32.mrf.mxu0 }
 0x193   : > { %v1346_v46 = vsel %vm1337_vm5, %v1282_v42, 0.0  ;;  %v1283_v47 = vadd.f32 %v1237_v45, %v1158_v41 }
 0x194   : > { %v1239_v49 = vpop.f32.mrf.mxu0  ;;  %v1355_v52 = vmul.f32 %v1346_v46, %v1346_v46 }
 0x195   : > { %v1347_v51 = vsel %vm1338_vm6, %v1283_v47, 0.0 }
 0x196   : > { %v1356_v53 = vmul.f32 %v1347_v51, %v1347_v51  ;;  %v1240_v55 = vpop.f32.mrf.mxu0  ;;  %v1349_v57 = vadd.f32 %v1347_v51, %v1346_v46 }
 0x198   : > { %v1352_v59 = vadd.f32 %v1351_v58, %v1349_v57  ;;  %v1358_v6 = vadd.f32 %v1356_v53, %v1355_v52 }
 0x19a   : > { %1353 = vadd.xlane.f32.xlu0 %v1352_v59  ;;  %v1360_v63 = vadd.f32 %v1359_v61, %v1358_v6 }
 0x19c   : > { %1361 = vadd.xlane.f32.xlu1 %v1360_v63 }
 0x223   : > { %v1354_v2 = vpop.xlane.xlu0 %1353 }
 0x224   : > { %v1363_v4 = vmul.f32 0.00390625, %v1354_v2 }
 0x225   : > { %v1362_v7 = vpop.xlane.xlu1 %1361 }
 0x226   : > { %v1365_v8 = vmul.f32 %v1363_v4, %v1363_v4  ;;  %v1364_v10 = vmul.f32 0.00390625, %v1362_v7 }
 0x228   : > { %v1366_v12 = vsub.f32 %v1364_v10, %v1365_v8 }
 0x22a   : > { %v1368_v13 = vadd.f32 1e-05, %v1366_v12 }
 0x22c   : > { %1626 = vrsqrt.f32 %v1368_v13 }
 0x239   : > { %v1627_v16 = vpop.eup %1626 }
 0x23a   : > { %v1370_v18 = vmul.f32 %v1627_v16, %v1367_v15 }
 0x23c   : > { %1376 = vperm.xlu0 %1616, %v1370_v18   ;;  %v1372_v60 = vmul.f32 %v1370_v18, %v1363_v4 }
 0x23e   : > { %v1373_v5 = vsub.f32 %v1371_v54, %v1372_v60 }
 0x240   : > { %1384 = vperm.xlu1 %1617, %v1373_v5  }
 0x2b7   : > { %v1377_v21 = vpop.permute.xlu0 %1376 }
 0x2b8   : > { %v1379_v56 = vmul.f32 %v1377_v21, %v1282_v42  ;;  %v1380_v62 = vmul.f32 %v1377_v21, %v1283_v47  ;;  %v1381_v14 = vmul.f32 %v1377_v21, %v1284_v36 }
 0x2bb   : > { %v1385_v20 = vpop.permute.xlu1 %1384 }
 0x2bc   : > { %v1387_v22 = vadd.f32 %v1385_v20, %v1379_v56  ;;  %v1388_v3 = vadd.f32 %v1385_v20, %v1380_v62  ;;  %v1389_v1 = vadd.f32 %v1385_v20, %v1381_v14 }
 0x2be   : > { %vm1390_vm8 = vcmp.gt.f32.partialorder %v1387_v22, 0.0  ;;  %vm1391_vm9 = vcmp.gt.f32.partialorder %v1388_v3, 0.0  ;;  %vm1392_vm10 = vcmp.gt.f32.partialorder %v1389_v1, 0.0  ;;  %v1393_v9 = vmul.f32 0.2, %v1387_v22 }
 0x2bf   : > { %v1394_v23 = vmul.f32 0.2, %v1388_v3  ;;  %v1395_v11 = vmul.f32 0.2, %v1389_v1 }
 0x2c0   : > { %v1396_v17 = vsel %vm1390_vm8, %v1387_v22, %v1393_v9 }
 0x2c1   : > { %v1397_v24 = vsel %vm1391_vm9, %v1388_v3, %v1394_v23  ;;  %v1398_v25 = vsel %vm1392_vm10, %v1389_v1, %v1395_v11  ;;  %1399 = vst [vmem:[%s190_s26] sm:$0xff] %v1396_v17 }
 0x2c2   : > { %1400 = vst [vmem:[%s190_s26 + $0x8] sm:$0xff] %v1397_v24  ;;  %1401 = vst.msk [vmem:[%s190_s26 + $0x10] sm:$0xff] %vm1350_vm7, %v1398_v25 }
 0x2c3 PF: > { %s13_s12 = sadd.s32 1, %s1634_s12  }
 0x2c4   : > { %p10_p4 = scmp.ge.s32.totalorder %s13_s12, 4  }
 0x2c6   :  { %12 = sbr.rel (!%p10_p4) target bundleno = 1 (0x1), region = 73 }

</bundles_post_ra>
